<compile_context>
chip_gen: v6e
topology: v6e:2x2x1
jax: 0.10.0
libtpu: 0.0.40
codegen_flags: <defaults>
</compile_context>

<pallas_src>
import functools

import jax
import jax.numpy as jnp
from jax.experimental import pallas as pl
from jax.experimental.pallas import tpu as pltpu

LANES = 128
SUBLANES = 8
MAX_TILE_ROWS = 2048  # 2048*128*4B = 1 MiB per input tile; 4 MiB double-buffered.


def _make_mse_partial_kernel(tile_rows, total_rows, need_mask):
    """Kernel producing an (8,128) partial sum of squared differences."""

    def kernel(x_ref, y_ref, o_ref):
        i = pl.program_id(0)

        # Output block is resident across the whole ("arbitrary") grid axis:
        # zero it on the first step only.
        @pl.when(i == 0)
        def _():
            o_ref[...] = jnp.zeros_like(o_ref)

        d = x_ref[...] - y_ref[...]
        sq = d * d

        if need_mask:
            # Last grid step may read past the end of the array (unspecified
            # data); zero out rows beyond the real extent.
            row_ids = i * tile_rows + jax.lax.broadcasted_iota(
                jnp.int32, (tile_rows, LANES), 0
            )
            sq = jnp.where(row_ids < total_rows, sq, jnp.float32(0.0))

        # Fold the tile onto the (8,128) accumulator with vreg-wise (VPU) adds
        # only; no cross-lane/sublane reduction inside the grid loop.
        o_ref[...] += sq.reshape(tile_rows // SUBLANES, SUBLANES, LANES).sum(axis=0)

    return kernel


@functools.partial(jax.jit, static_argnames=())
def mse_loss_pallas(inp, tgt):
    assert inp.shape == tgt.shape, "MSELoss requires matching shapes"
    n = inp.size

    x = jnp.ravel(inp).astype(jnp.float32)
    y = jnp.ravel(tgt).astype(jnp.float32)

    # Pad only if the element count is not a multiple of one (8,128) vreg.
    # For the shipped 2048-element case this is a no-op (no extra HBM traffic).
    vreg = SUBLANES * LANES
    padded_n = ((n + vreg - 1) // vreg) * vreg
    if padded_n != n:
        x = jnp.pad(x, (0, padded_n - n))
        y = jnp.pad(y, (0, padded_n - n))

    rows = padded_n // LANES                      # multiple of 8
    x = x.reshape(rows, LANES)
    y = y.reshape(rows, LANES)

    tile_rows = min(rows, MAX_TILE_ROWS)          # multiple of 8 by construction
    grid_size = pl.cdiv(rows, tile_rows)
    need_mask = (rows % tile_rows) != 0           # static

    kernel = _make_mse_partial_kernel(tile_rows, rows, need_mask)

    partial = pl.pallas_call(
        kernel,
        out_shape=jax.ShapeDtypeStruct((SUBLANES, LANES), jnp.float32),
        grid_spec=pltpu.PrefetchScalarGridSpec(
            num_scalar_prefetch=0,
            grid=(grid_size,),
            in_specs=[
                pl.BlockSpec((tile_rows, LANES), lambda i: (i, 0)),
                pl.BlockSpec((tile_rows, LANES), lambda i: (i, 0)),
            ],
            out_specs=pl.BlockSpec((SUBLANES, LANES), lambda i: (0, 0)),
        ),
        compiler_params=pltpu.CompilerParams(
            dimension_semantics=("arbitrary",),
        ),
    )(x, y)

    # Single cross-lane reduce + fold the (100^2) scale and the mean into one
    # scalar expression in glue: mean((100x - 100y)^2) == 1e4 * sum((x-y)^2)/n.
    return (jnp.sum(partial) * jnp.float32(1e4) / jnp.float32(n)).astype(jnp.float32)


def mse_loss_ref(inp, tgt):
    a = inp.astype(jnp.float32) * 100.0
    b = tgt.astype(jnp.float32) * 100.0
    return jnp.mean((a - b) ** 2)


if __name__ == "__main__":
    key = jax.random.PRNGKey(0)
    k1, k2 = jax.random.split(key)
    # NCHW, as the PyTorch module would receive.
    inp = jax.random.normal(k1, (2, 4, 16, 16), dtype=jnp.float32)
    tgt = jax.random.normal(k2, (2, 4, 16, 16), dtype=jnp.float32)

    out = mse_loss_pallas(inp, tgt)
    out = jax.block_until_ready(out)

    ref = mse_loss_ref(inp, tgt)
    assert jnp.allclose(out, ref, rtol=1e-5, atol=1e-3), (out, ref)
    print("KERNEL_OK")
</pallas_src>

<mosaic_0001>
module attributes {stable_mosaic.version = 11 : i64} {
  func.func @kernel(%arg0: i32, %arg1: memref<16x128xf32, #tpu.memory_space<vmem>>, %arg2: memref<16x128xf32, #tpu.memory_space<vmem>>, %arg3: memref<8x128xf32, #tpu.memory_space<vmem>>) attributes {dimension_semantics = [#tpu.dimension_semantics<arbitrary>], iteration_bounds = array<i64: 1>, scalar_prefetch = 0 : i64, scratch_operands = 0 : i64, tpu.core_type = #tpu.core_type<tc>, window_params = [{transform_indices = @transform_0, window_bounds = array<i64: 16, 128>}, {transform_indices = @transform_1, window_bounds = array<i64: 16, 128>}, {pipeline_mode = #tpu.pipeline_mode<synchronous>, transform_indices = @transform_2, window_bounds = array<i64: 8, 128>}]} {
    %c0_i32 = arith.constant 0 : i32
    %0 = arith.cmpi eq, %arg0, %c0_i32 : i32
    %1 = arith.extui %0 : i1 to i32
    %c0_i32_0 = arith.constant 0 : i32
    %2 = arith.cmpi ne, %1, %c0_i32_0 : i32
    scf.if %2 {
      %cst_8 = arith.constant 0.000000e+00 : f32
      %12 = vector.broadcast %cst_8 : f32 to vector<8x128xf32>
      %c0_9 = arith.constant 0 : index
      %c0_10 = arith.constant 0 : index
      %13 = vector.load %arg3[%c0_9, %c0_10] : memref<8x128xf32, #tpu.memory_space<vmem>>, vector<8x128xf32>
      tpu.vector_store %arg3[%c0_9, %c0_10], %12 {strides = array<i32>} : memref<8x128xf32, #tpu.memory_space<vmem>>, vector<8x128xf32>,
    } else {
    }
    %c0 = arith.constant 0 : index
    %c0_1 = arith.constant 0 : index
    %3 = vector.load %arg1[%c0, %c0_1] : memref<16x128xf32, #tpu.memory_space<vmem>>, vector<16x128xf32>
    %c0_2 = arith.constant 0 : index
    %c0_3 = arith.constant 0 : index
    %4 = vector.load %arg2[%c0_2, %c0_3] : memref<16x128xf32, #tpu.memory_space<vmem>>, vector<16x128xf32>
    %5 = arith.subf %3, %4 : vector<16x128xf32>
    %6 = arith.mulf %5, %5 : vector<16x128xf32>
    %c0_4 = arith.constant 0 : index
    %c0_5 = arith.constant 0 : index
    %7 = vector.load %arg3[%c0_4, %c0_5] : memref<8x128xf32, #tpu.memory_space<vmem>>, vector<8x128xf32>
    %8 = vector.shape_cast %6 : vector<16x128xf32> to vector<2x8x128xf32>
    %cst = arith.constant dense<0.000000e+00> : vector<8x128xf32>
    %9 = vector.multi_reduction <add>, %8, %cst [0] : vector<2x8x128xf32> to vector<8x128xf32>
    %10 = arith.addf %7, %9 : vector<8x128xf32>
    %c0_6 = arith.constant 0 : index
    %c0_7 = arith.constant 0 : index
    %11 = vector.load %arg3[%c0_6, %c0_7] : memref<8x128xf32, #tpu.memory_space<vmem>>, vector<8x128xf32>
    tpu.vector_store %arg3[%c0_6, %c0_7], %10 {strides = array<i32>} : memref<8x128xf32, #tpu.memory_space<vmem>>, vector<8x128xf32>,
    return
  }
  func.func @transform_0(%arg0: i32) -> (i32, i32) {
    %c0_i32 = arith.constant 0 : i32
    %c0_i32_0 = arith.constant 0 : i32
    return %arg0, %c0_i32 : i32, i32
  }
  func.func @transform_1(%arg0: i32) -> (i32, i32) {
    %c0_i32 = arith.constant 0 : i32
    %c0_i32_0 = arith.constant 0 : i32
    return %arg0, %c0_i32 : i32, i32
  }
  func.func @transform_2(%arg0: i32) -> (i32, i32) {
    %c0_i32 = arith.constant 0 : i32
    %c0_i32_0 = arith.constant 0 : i32
    %c0_i32_1 = arith.constant 0 : i32
    return %c0_i32, %c0_i32_0 : i32, i32
  }
}

</mosaic_0001>

<bundles_post_ra>
// kernel: mse_loss_pallas.1
= control target key start
LH: loop header
LB: loop body
LE: loop exit
PB: predicated region body
PF: predicated region fallthrough
CT: control target
= control target key end

     0   :  { %s63_s0 = inlined_call_operand.vmem [shape: f32[16,128], index: 0, kind: input, shape index: {}]   ;;  %s64_s1 = inlined_call_operand.vmem [shape: f32[16,128], index: 1, kind: input, shape index: {}]   ;;  %s65_s2 = inlined_call_operand.vmem [shape: f32[8,128], index: 2, kind: output, shape index: {}]  }
   0x1   :  { %v16_v0 = vld [vmem:[%s63_s0] sm:$0xff]  ;;  %v17_v1 = vld [vmem:[%s63_s0 + $0x8] sm:$0xff] }
   0x2   :  { %v18_v2 = vld [vmem:[%s64_s1] sm:$0xff]  ;;  %v19_v3 = vld [vmem:[%s64_s1 + $0x8] sm:$0xff] }
   0x3   :  { %v20_v4 = vsub.f32 %v16_v0, %v18_v2  ;;  %v21_v5 = vsub.f32 %v17_v1, %v19_v3 }
   0x5   :  { %v22_v6 = vmul.f32 %v20_v4, %v20_v4  ;;  %v23_v7 = vmul.f32 %v21_v5, %v21_v5 }
   0x7   :  { %v25_v8 = vadd.f32 %v23_v7, %v22_v6 }
   0x9   :  { %27 = vst [vmem:[%s65_s2] sm:$0xff] %v25_v8 }

</bundles_post_ra>
